<compile_context>
chip_gen: v7x
topology: tpu7x:2x2x1
jax: 0.10.0
libtpu: 0.0.40
codegen_flags: <defaults>
</compile_context>

<pallas_src>
import functools

import jax
import jax.numpy as jnp
from jax.experimental import pallas as pl
from jax.experimental.pallas import tpu as pltpu

LANE = 128  # TPU vreg lane width


def vae_kernel(x_ref,
               we_ref, be_ref,       # encoder hidden    (n_contour, n_hidden_e), (1, n_hidden_e)
               wml_ref, bml_ref,     # fused mu|logvar   (n_hidden_e, head_w),    (1, head_w)
               whd_ref, bhd_ref,     # folded dec hidden (n_hidden_e, n_hidden_d),(1, n_hidden_d)
               wo_ref, bo_ref,       # decoder out       (n_hidden_d, n_contour), (1, n_contour)
               out_ref):             # packed output     (TB, n_contour + head_w) -- mult of 128
    x = x_ref[...]

    # encoder hidden + tanh  (tanh goes to EUP; free slot relative to MXU chain)
    h = jnp.tanh(
        jnp.dot(x, we_ref[...], preferred_element_type=jnp.float32) + be_ref[...]
    )

    # fused latent heads: [mu | logvar | zero-pad] in one MXU pass
    ml = jnp.dot(h, wml_ref[...], preferred_element_type=jnp.float32) + bml_ref[...]

    # eval-mode folded decoder hidden: tanh(h @ (Wmu^T Wd^T) + (bmu Wd^T + bd))
    # (== tanh(mu @ Wd^T + bd) since z = mu); independent of the ml branch, so
    # the MXU can pipeline it against the head matmul.
    d = jnp.tanh(
        jnp.dot(h, whd_ref[...], preferred_element_type=jnp.float32) + bhd_ref[...]
    )

    # output projection
    y = jnp.dot(d, wo_ref[...], preferred_element_type=jnp.float32) + bo_ref[...]

    # single lane-dense packed store: [ y | mu | logvar | 0-pad ]  (width % 128 == 0)
    out_ref[...] = jnp.concatenate([y, ml], axis=-1)


def init_linear(key, n_in, n_out):
    """PyTorch nn.Linear default init: U(-1/sqrt(fan_in), 1/sqrt(fan_in))."""
    kw, kb = jax.random.split(key)
    bound = 1.0 / jnp.sqrt(jnp.float32(n_in))
    w = jax.random.uniform(kw, (n_out, n_in), jnp.float32, -bound, bound)
    b = jax.random.uniform(kb, (n_out,), jnp.float32, -bound, bound)
    return w, b


def prepare_vae_params(params):
    """One-time layout conversion (hoisted out of the per-call path).

    Transposes weights to (in, out), fuses the mu/logvar heads (zero-padded so
    the packed output slab is a multiple of 128 lanes), and folds the decoder
    hidden layer through the mu head for the eval-mode (z = mu) path.
    """
    (we, be), (wmu, bmu), (wlv, blv), (wd, bd), (wo, bo) = params

    n_hidden_e, n_contour = we.shape[0], we.shape[1]
    n_latent = wmu.shape[0]

    w_enc = we.T.astype(jnp.float32)                     # (n_contour, n_hidden_e)
    b_enc = be.reshape(1, -1).astype(jnp.float32)

    # fused + lane-padded [mu | logvar | 0] head so n_contour + head_w is a
    # multiple of 128 -> the packed output store is unmasked / lane-dense.
    raw_out = n_contour + 2 * n_latent
    padded_out = ((raw_out + LANE - 1) // LANE) * LANE
    head_w = padded_out - n_contour                      # >= 2*n_latent
    w_ml = jnp.zeros((n_hidden_e, head_w), jnp.float32)
    w_ml = w_ml.at[:, :n_latent].set(wmu.T).at[:, n_latent:2 * n_latent].set(wlv.T)
    b_ml = jnp.zeros((1, head_w), jnp.float32)
    b_ml = b_ml.at[0, :n_latent].set(bmu).at[0, n_latent:2 * n_latent].set(blv)

    # eval-mode fold of dec_hidden0 through the mu head (z = mu).
    w_hd = (wmu.T @ wd.T).astype(jnp.float32)            # (n_hidden_e, n_hidden_d)
    b_hd = (bmu @ wd.T + bd).reshape(1, -1).astype(jnp.float32)

    w_out = wo.T.astype(jnp.float32)                     # (n_hidden_d, n_contour)
    b_out = bo.reshape(1, -1).astype(jnp.float32)

    kparams = (w_enc, b_enc, w_ml, b_ml, w_hd, b_hd, w_out, b_out)
    return kparams, n_contour, n_latent


@functools.partial(jax.jit, static_argnames=("n_contour", "n_latent", "block_batch"))
def vae_forward(x, kparams, *, n_contour, n_latent, block_batch=256):
    """Run the fused VAE forward. Returns (y, z, mu, logvar) like the module."""
    w_enc, b_enc, w_ml, b_ml, w_hd, b_hd, w_out, b_out = kparams

    batch = x.shape[0]
    n_out = n_contour + w_ml.shape[1]          # packed slab width, multiple of 128

    # Batch tile: at least 8 (sublane-aligned), at most block_batch rows/step.
    tb = min(block_batch, max(8, ((batch + 7) // 8) * 8))
    padded = ((batch + tb - 1) // tb) * tb
    if padded != batch:
        x = jnp.pad(x, ((0, padded - batch), (0, 0)))

    const = lambda i: (0, 0)      # weights: same block every step -> fetched once
    tile = lambda i: (i, 0)       # x / packed output: tiled over batch

    out = pl.pallas_call(
        vae_kernel,
        out_shape=jax.ShapeDtypeStruct((padded, n_out), jnp.float32),
        grid_spec=pltpu.PrefetchScalarGridSpec(
            num_scalar_prefetch=0,
            grid=(padded // tb,),
            in_specs=[
                pl.BlockSpec((tb, n_contour), tile),
                pl.BlockSpec(w_enc.shape, const),
                pl.BlockSpec(b_enc.shape, const),
                pl.BlockSpec(w_ml.shape, const),
                pl.BlockSpec(b_ml.shape, const),
                pl.BlockSpec(w_hd.shape, const),
                pl.BlockSpec(b_hd.shape, const),
                pl.BlockSpec(w_out.shape, const),
                pl.BlockSpec(b_out.shape, const),
            ],
            out_specs=pl.BlockSpec((tb, n_out), tile),
        ),
        compiler_params=pltpu.CompilerParams(
            dimension_semantics=("parallel",),
        ),
    )(x, w_enc, b_enc, w_ml, b_ml, w_hd, b_hd, w_out, b_out)

    # Unpack the lane-dense slab (glue only).
    y = out[:batch, :n_contour]
    mu = out[:batch, n_contour:n_contour + n_latent]
    logvar = out[:batch, n_contour + n_latent:n_contour + 2 * n_latent]
    z = mu  # eval mode: z == mu
    return y, z, mu, logvar


def vae_forward_ref(x, params):
    """Pure-JAX reference (unfused, PyTorch layout) for correctness checking."""
    (we, be), (wmu, bmu), (wlv, blv), (wd, bd), (wo, bo) = params
    h = jnp.tanh(x @ we.T + be)
    mu = h @ wmu.T + bmu
    logvar = h @ wlv.T + blv
    z = mu
    d = jnp.tanh(z @ wd.T + bd)
    y = d @ wo.T + bo
    return y, z, mu, logvar


if __name__ == "__main__":
    # Small, module-consistent shapes:
    #   n_contour=32, enc_n_hiddens=[32], n_latent=8, dec_n_hiddens=[32], batch=8
    n_contour, n_hidden, n_latent, batch = 32, 32, 8, 8

    key = jax.random.PRNGKey(0)
    k_x, k_e0, k_mu, k_lv, k_d0, k_out = jax.random.split(key, 6)

    params = (
        init_linear(k_e0, n_contour, n_hidden),   # enc_hidden0
        init_linear(k_mu, n_hidden, n_latent),    # enc_mu
        init_linear(k_lv, n_hidden, n_latent),    # enc_logvar
        init_linear(k_d0, n_latent, n_hidden),    # dec_hidden0
        init_linear(k_out, n_hidden, n_contour),  # dec_out
    )

    x = jax.random.normal(k_x, (batch, n_contour), jnp.float32)

    # One-time layout prep (transpose / head fusion / eval-mode decoder fold).
    kparams, nc, nl = prepare_vae_params(params)

    y, z, mu, logvar = vae_forward(x, kparams, n_contour=nc, n_latent=nl)
    jax.block_until_ready((y, z, mu, logvar))

    # Correctness check against pure-JAX reference.
    y_r, z_r, mu_r, lv_r = vae_forward_ref(x, params)
    assert jnp.allclose(y, y_r, atol=1e-5), "y mismatch"
    assert jnp.allclose(z, z_r, atol=1e-5), "z mismatch"
    assert jnp.allclose(mu, mu_r, atol=1e-5), "mu mismatch"
    assert jnp.allclose(logvar, lv_r, atol=1e-5), "logvar mismatch"

    print("KERNEL_OK")
</pallas_src>

<mosaic_0001>
module attributes {stable_mosaic.version = 11 : i64} {
  func.func @vae_kernel(%arg0: i32, %arg1: memref<8x32xf32, #tpu.memory_space<vmem>>, %arg2: memref<32x32xf32, #tpu.memory_space<vmem>>, %arg3: memref<1x32xf32, #tpu.memory_space<vmem>>, %arg4: memref<32x96xf32, #tpu.memory_space<vmem>>, %arg5: memref<1x96xf32, #tpu.memory_space<vmem>>, %arg6: memref<32x32xf32, #tpu.memory_space<vmem>>, %arg7: memref<1x32xf32, #tpu.memory_space<vmem>>, %arg8: memref<32x32xf32, #tpu.memory_space<vmem>>, %arg9: memref<1x32xf32, #tpu.memory_space<vmem>>, %arg10: memref<8x128xf32, #tpu.memory_space<vmem>>) attributes {dimension_semantics = [#tpu.dimension_semantics<parallel>], iteration_bounds = array<i64: 1>, scalar_prefetch = 0 : i64, scratch_operands = 0 : i64, tpu.core_type = #tpu.core_type<tc>, window_params = [{transform_indices = @transform_0, window_bounds = array<i64: 8, 32>}, {pipeline_mode = #tpu.pipeline_mode<synchronous>, transform_indices = @transform_1, window_bounds = array<i64: 32, 32>}, {pipeline_mode = #tpu.pipeline_mode<synchronous>, transform_indices = @transform_2, window_bounds = array<i64: 1, 32>}, {pipeline_mode = #tpu.pipeline_mode<synchronous>, transform_indices = @transform_3, window_bounds = array<i64: 32, 96>}, {pipeline_mode = #tpu.pipeline_mode<synchronous>, transform_indices = @transform_4, window_bounds = array<i64: 1, 96>}, {pipeline_mode = #tpu.pipeline_mode<synchronous>, transform_indices = @transform_5, window_bounds = array<i64: 32, 32>}, {pipeline_mode = #tpu.pipeline_mode<synchronous>, transform_indices = @transform_6, window_bounds = array<i64: 1, 32>}, {pipeline_mode = #tpu.pipeline_mode<synchronous>, transform_indices = @transform_7, window_bounds = array<i64: 32, 32>}, {pipeline_mode = #tpu.pipeline_mode<synchronous>, transform_indices = @transform_8, window_bounds = array<i64: 1, 32>}, {transform_indices = @transform_9, window_bounds = array<i64: 8, 128>}]} {
    %c0 = arith.constant 0 : index
    %c0_0 = arith.constant 0 : index
    %0 = vector.load %arg1[%c0, %c0_0] : memref<8x32xf32, #tpu.memory_space<vmem>>, vector<8x32xf32>
    %c0_1 = arith.constant 0 : index
    %c0_2 = arith.constant 0 : index
    %1 = vector.load %arg2[%c0_1, %c0_2] : memref<32x32xf32, #tpu.memory_space<vmem>>, vector<32x32xf32>
    %cst = arith.constant dense<0.000000e+00> : vector<8x32xf32>
    %2 = tpu.matmul %0, %1, %cst {dimension_numbers = #tpu.dot_dimension_numbers<[1], [0], [0], [1], [0, 0, 1, 1], [], []>} : vector<8x32xf32>, vector<32x32xf32>, vector<8x32xf32> -> vector<8x32xf32>
    %c0_3 = arith.constant 0 : index
    %c0_4 = arith.constant 0 : index
    %3 = vector.load %arg3[%c0_3, %c0_4] : memref<1x32xf32, #tpu.memory_space<vmem>>, vector<1x32xf32>
    %4 = vector.broadcast %3 : vector<1x32xf32> to vector<8x32xf32>
    %5 = arith.addf %2, %4 : vector<8x32xf32>
    %6 = math.tanh %5 : vector<8x32xf32>
    %c0_5 = arith.constant 0 : index
    %c0_6 = arith.constant 0 : index
    %7 = vector.load %arg4[%c0_5, %c0_6] : memref<32x96xf32, #tpu.memory_space<vmem>>, vector<32x96xf32>
    %cst_7 = arith.constant dense<0.000000e+00> : vector<8x96xf32>
    %8 = tpu.matmul %6, %7, %cst_7 {dimension_numbers = #tpu.dot_dimension_numbers<[1], [0], [0], [1], [0, 0, 1, 1], [], []>} : vector<8x32xf32>, vector<32x96xf32>, vector<8x96xf32> -> vector<8x96xf32>
    %c0_8 = arith.constant 0 : index
    %c0_9 = arith.constant 0 : index
    %9 = vector.load %arg5[%c0_8, %c0_9] : memref<1x96xf32, #tpu.memory_space<vmem>>, vector<1x96xf32>
    %10 = vector.broadcast %9 : vector<1x96xf32> to vector<8x96xf32>
    %11 = arith.addf %8, %10 : vector<8x96xf32>
    %c0_10 = arith.constant 0 : index
    %c0_11 = arith.constant 0 : index
    %12 = vector.load %arg6[%c0_10, %c0_11] : memref<32x32xf32, #tpu.memory_space<vmem>>, vector<32x32xf32>
    %cst_12 = arith.constant dense<0.000000e+00> : vector<8x32xf32>
    %13 = tpu.matmul %6, %12, %cst_12 {dimension_numbers = #tpu.dot_dimension_numbers<[1], [0], [0], [1], [0, 0, 1, 1], [], []>} : vector<8x32xf32>, vector<32x32xf32>, vector<8x32xf32> -> vector<8x32xf32>
    %c0_13 = arith.constant 0 : index
    %c0_14 = arith.constant 0 : index
    %14 = vector.load %arg7[%c0_13, %c0_14] : memref<1x32xf32, #tpu.memory_space<vmem>>, vector<1x32xf32>
    %15 = vector.broadcast %14 : vector<1x32xf32> to vector<8x32xf32>
    %16 = arith.addf %13, %15 : vector<8x32xf32>
    %17 = math.tanh %16 : vector<8x32xf32>
    %c0_15 = arith.constant 0 : index
    %c0_16 = arith.constant 0 : index
    %18 = vector.load %arg8[%c0_15, %c0_16] : memref<32x32xf32, #tpu.memory_space<vmem>>, vector<32x32xf32>
    %cst_17 = arith.constant dense<0.000000e+00> : vector<8x32xf32>
    %19 = tpu.matmul %17, %18, %cst_17 {dimension_numbers = #tpu.dot_dimension_numbers<[1], [0], [0], [1], [0, 0, 1, 1], [], []>} : vector<8x32xf32>, vector<32x32xf32>, vector<8x32xf32> -> vector<8x32xf32>
    %c0_18 = arith.constant 0 : index
    %c0_19 = arith.constant 0 : index
    %20 = vector.load %arg9[%c0_18, %c0_19] : memref<1x32xf32, #tpu.memory_space<vmem>>, vector<1x32xf32>
    %21 = vector.broadcast %20 : vector<1x32xf32> to vector<8x32xf32>
    %22 = arith.addf %19, %21 : vector<8x32xf32>
    %23 = tpu.concatenate %22, %11 in 1 : vector<8x32xf32>, vector<8x96xf32> -> vector<8x128xf32>
    %c0_20 = arith.constant 0 : index
    %c0_21 = arith.constant 0 : index
    %24 = vector.load %arg10[%c0_20, %c0_21] : memref<8x128xf32, #tpu.memory_space<vmem>>, vector<8x128xf32>
    tpu.vector_store %arg10[%c0_20, %c0_21], %23 {strides = array<i32>} : memref<8x128xf32, #tpu.memory_space<vmem>>, vector<8x128xf32>,
    return
  }
  func.func @transform_0(%arg0: i32) -> (i32, i32) {
    %c0_i32 = arith.constant 0 : i32
    %c0_i32_0 = arith.constant 0 : i32
    return %arg0, %c0_i32 : i32, i32
  }
  func.func @transform_1(%arg0: i32) -> (i32, i32) {
    %c0_i32 = arith.constant 0 : i32
    %c0_i32_0 = arith.constant 0 : i32
    %c0_i32_1 = arith.constant 0 : i32
    return %c0_i32, %c0_i32_0 : i32, i32
  }
  func.func @transform_2(%arg0: i32) -> (i32, i32) {
    %c0_i32 = arith.constant 0 : i32
    %c0_i32_0 = arith.constant 0 : i32
    %c0_i32_1 = arith.constant 0 : i32
    return %c0_i32, %c0_i32_0 : i32, i32
  }
  func.func @transform_3(%arg0: i32) -> (i32, i32) {
    %c0_i32 = arith.constant 0 : i32
    %c0_i32_0 = arith.constant 0 : i32
    %c0_i32_1 = arith.constant 0 : i32
    return %c0_i32, %c0_i32_0 : i32, i32
  }
  func.func @transform_4(%arg0: i32) -> (i32, i32) {
    %c0_i32 = arith.constant 0 : i32
    %c0_i32_0 = arith.constant 0 : i32
    %c0_i32_1 = arith.constant 0 : i32
    return %c0_i32, %c0_i32_0 : i32, i32
  }
  func.func @transform_5(%arg0: i32) -> (i32, i32) {
    %c0_i32 = arith.constant 0 : i32
    %c0_i32_0 = arith.constant 0 : i32
    %c0_i32_1 = arith.constant 0 : i32
    return %c0_i32, %c0_i32_0 : i32, i32
  }
  func.func @transform_6(%arg0: i32) -> (i32, i32) {
    %c0_i32 = arith.constant 0 : i32
    %c0_i32_0 = arith.constant 0 : i32
    %c0_i32_1 = arith.constant 0 : i32
    return %c0_i32, %c0_i32_0 : i32, i32
  }
  func.func @transform_7(%arg0: i32) -> (i32, i32) {
    %c0_i32 = arith.constant 0 : i32
    %c0_i32_0 = arith.constant 0 : i32
    %c0_i32_1 = arith.constant 0 : i32
    return %c0_i32, %c0_i32_0 : i32, i32
  }
  func.func @transform_8(%arg0: i32) -> (i32, i32) {
    %c0_i32 = arith.constant 0 : i32
    %c0_i32_0 = arith.constant 0 : i32
    %c0_i32_1 = arith.constant 0 : i32
    return %c0_i32, %c0_i32_0 : i32, i32
  }
  func.func @transform_9(%arg0: i32) -> (i32, i32) {
    %c0_i32 = arith.constant 0 : i32
    %c0_i32_0 = arith.constant 0 : i32
    return %arg0, %c0_i32 : i32, i32
  }
}

</mosaic_0001>

<bundles_post_ra>
// kernel: vae_forward.1
= control target key start
LH: loop header
LB: loop body
LE: loop exit
PB: predicated region body
PF: predicated region fallthrough
CT: control target
= control target key end

     0   :  { %14 = vsyncpa [#allocation3], 0  ;;  %s832_s0 = inlined_call_operand.hbm [shape: f32[8,32], index: 0, kind: input, shape index: {}]   ;;  %s833_s1 = inlined_call_operand.hbm [shape: f32[32,32], index: 1, kind: input, shape index: {}]   ;;  %s834_s2 = inlined_call_operand.vmem [shape: f32[1,32], index: 2, kind: input, shape index: {}]   ;;  %s835_s3 = inlined_call_operand.hbm [shape: f32[32,96], index: 3, kind: input, shape index: {}]   ;;  %s836_s4 = inlined_call_operand.vmem [shape: f32[1,96], index: 4, kind: input, shape index: {}]   ;;  %s837_s5 = inlined_call_operand.hbm [shape: f32[32,32], index: 5, kind: input, shape index: {}]   ;;  %s838_s6 = inlined_call_operand.vmem [shape: f32[1,32], index: 6, kind: input, shape index: {}]   ;;  %s839_s7 = inlined_call_operand.hbm [shape: f32[32,32], index: 7, kind: input, shape index: {}]   ;;  %s840_s8 = inlined_call_operand.vmem [shape: f32[1,32], index: 8, kind: input, shape index: {}]   ;;  %s841_s9 = inlined_call_operand.vmem [shape: f32[8,128], index: 9, kind: output, shape index: {}]  }
   0x1   :  { %15 = vsyncpa [#allocation5], 0 }
   0x2   :  { %16 = vsyncpa [#allocation8], 0  ;;  %s675_s30 = smov [#allocation4]   ;;  %s559_s13 = scalar_lea.hbm %s833_s1, 512 }
   0x3   :  { %s32_s10 = sshll.u32 %s675_s30, 4  ;;  %p560_p0 = scmp.ne.s32.totalorder %s833_s1, %s559_s13  ;;  %s33_s10 = int_to_ptr.vmem [resolvable:$true] %s32_s10 }
   0x4   :  { %p563_p1 = scmp.lt.u32.totalorder %s559_s13, %s833_s1 }
   0x6   :  { %p565_p2 = pnand %p563_p1, %p560_p0 }
   0x8   :  { %568 = shalt.err (!%p565_p2)
}
   0x9   :  { %s569_s18 = scalar_lea.vmem %s33_s10, 512  ;;  %p574_p4 = scmp.lt.s32.totalorder %s33_s10, %s33_s10 }
   0xa   :  { %p570_p3 = scmp.ne.s32.totalorder %s33_s10, %s569_s18  ;;  %p575_p5 = scmp.lt.s32.totalorder %s569_s18, %s569_s18 }
   0xc   :  { %p576_p6 = por %p575_p5, %p574_p4 }
   0xe   :  { %p577_p7 = pnand %p576_p6, %p570_p3 }
  0x10   :  { %580 = shalt.err (!%p577_p7)
}
  0x11   :  { %s676_s19 = smov 128   ;;  %s677_s20 = smov 8  }
  0x12   :  { %38 = dma.hbm_to_vmem [thread:$0]  %s833_s1, 512, %s33_s10, [#allocation5], %s676_s19, %s676_s19, %s677_s20  }
  0x13   :  { %s678_s23 = smov [#allocation7]   ;;  %s679_s25 = smov [#allocation2]  }
  0x14   :  { %s60_s24 = sshll.u32 %s678_s23, 4  ;;  %s23_s26 = sshll.u32 %s679_s25, 4  ;;  %s61_s24 = int_to_ptr.vmem [resolvable:$true] %s60_s24  ;;  %s24_s26 = int_to_ptr.vmem [resolvable:$true] %s23_s26 }
  0x15   :  { %s581_s29 = scalar_lea.hbm %s837_s5, 512 }
  0x16   :  { %p582_p8 = scmp.ne.s32.totalorder %s837_s5, %s581_s29  ;;  %p585_p9 = scmp.lt.u32.totalorder %s581_s29, %s837_s5 }
  0x18   :  { %p587_p10 = pnand %p585_p9, %p582_p8 }
  0x1a   :  { %590 = shalt.err (!%p587_p10)
}
  0x1b   :  { %s591_s1 = scalar_lea.vmem %s61_s24, 512  ;;  %p596_p12 = scmp.lt.s32.totalorder %s61_s24, %s61_s24 }
  0x1c   :  { %p592_p11 = scmp.ne.s32.totalorder %s61_s24, %s591_s1  ;;  %p597_p13 = scmp.lt.s32.totalorder %s591_s1, %s591_s1 }
  0x1e   :  { %p598_p0 = por %p597_p13, %p596_p12 }
  0x20   :  { %p599_p1 = pnand %p598_p0, %p592_p11 }
  0x22   :  { %602 = shalt.err (!%p599_p1)
}
  0x23   :  { %66 = dma.hbm_to_vmem [thread:$0]  %s837_s5, 512, %s61_s24, [#allocation8], %s676_s19, %s676_s19, %s677_s20  }
  0x24   :  { %s603_s17 = scalar_lea.hbm %s832_s0, 128 }
  0x25   :  { %p604_p2 = scmp.ne.s32.totalorder %s832_s0, %s603_s17  ;;  %p607_p3 = scmp.lt.u32.totalorder %s603_s17, %s832_s0 }
  0x27   :  { %p609_p4 = pnand %p607_p3, %p604_p2 }
  0x29   :  { %612 = shalt.err (!%p609_p4)
}
  0x2a   :  { %s613_s25 = scalar_lea.vmem %s24_s26, 128  ;;  %p618_p6 = scmp.lt.s32.totalorder %s24_s26, %s24_s26 }
  0x2b   :  { %p614_p5 = scmp.ne.s32.totalorder %s24_s26, %s613_s25  ;;  %p619_p7 = scmp.lt.s32.totalorder %s613_s25, %s613_s25 }
  0x2d   :  { %p620_p8 = por %p619_p7, %p618_p6 }
  0x2f   :  { %p621_p9 = pnand %p620_p8, %p614_p5 }
  0x31   :  { %624 = shalt.err (!%p621_p9)
}
  0x32   :  { %26 = dma.hbm_to_vmem [thread:$0]  %s832_s0, 128, %s24_s26, [#allocation3]  }
  0x33   :  { %s680_s27 = smov [#allocation6]   ;;  %s681_s29 = smov [#allocation9]  }
  0x34   :  { %s46_s28 = sshll.u32 %s680_s27, 4  ;;  %s74_s30 = sshll.u32 %s681_s29, 4  ;;  %s47_s28 = int_to_ptr.vmem [resolvable:$true] %s46_s28  ;;  %s75_s30 = int_to_ptr.vmem [resolvable:$true] %s74_s30 }
  0x35   :  { %s625_s13 = scalar_lea.hbm %s835_s3, 512 }
  0x36   :  { %p626_p10 = scmp.ne.s32.totalorder %s835_s3, %s625_s13  ;;  %p629_p11 = scmp.lt.u32.totalorder %s625_s13, %s835_s3 }
  0x38   :  { %p631_p12 = pnand %p629_p11, %p626_p10 }
  0x3a   :  { %634 = shalt.err (!%p631_p12)
}
  0x3b   :  { %s635_s0 = scalar_lea.vmem %s47_s28, 512  ;;  %p640_p0 = scmp.lt.s32.totalorder %s47_s28, %s47_s28 }
  0x3c   :  { %p636_p13 = scmp.ne.s32.totalorder %s47_s28, %s635_s0  ;;  %p641_p1 = scmp.lt.s32.totalorder %s635_s0, %s635_s0 }
  0x3e   :  { %p642_p2 = por %p641_p1, %p640_p0 }
  0x40   :  { %p643_p3 = pnand %p642_p2, %p636_p13 }
  0x42   :  { %646 = shalt.err (!%p643_p3)
}
  0x43   :  { %52 = dma.hbm_to_vmem [thread:$0]  %s835_s3, 512, %s47_s28, [#allocation5], %s676_s19, %s676_s19, %s677_s20  }
  0x44   :  { %s647_s21 = scalar_lea.hbm %s839_s7, 512 }
  0x45   :  { %p648_p4 = scmp.ne.s32.totalorder %s839_s7, %s647_s21  ;;  %p651_p5 = scmp.lt.u32.totalorder %s647_s21, %s839_s7 }
  0x47   :  { %p653_p6 = pnand %p651_p5, %p648_p4 }
  0x49   :  { %656 = shalt.err (!%p653_p6)
}
  0x4a   :  { %s657_s24 = scalar_lea.vmem %s75_s30, 512  ;;  %p662_p8 = scmp.lt.s32.totalorder %s75_s30, %s75_s30 }
  0x4b   :  { %p658_p7 = scmp.ne.s32.totalorder %s75_s30, %s657_s24  ;;  %p663_p9 = scmp.lt.s32.totalorder %s657_s24, %s657_s24 }
  0x4d   :  { %p664_p10 = por %p663_p9, %p662_p8 }
  0x4f   :  { %p665_p11 = pnand %p664_p10, %p658_p7 }
  0x51   :  { %668 = shalt.err (!%p665_p11)
}
  0x52   :  { %80 = dma.hbm_to_vmem [thread:$0]  %s839_s7, 512, %s75_s30, [#allocation8], %s676_s19, %s676_s19, %s677_s20  }
  0x53   :  { %669 = dma.done.wait [#allocation3], 128  }
  0x54   :  { %670 = vsyncadd [#allocation3], 4294967168 }
  0x55   :  { %671 = dma.done.wait [#allocation5], 1024  }
  0x56   :  { %672 = vsyncadd [#allocation5], 4294966272 }
  0x57   :  { %673 = dma.done.wait [#allocation8], 1024  }
  0x58   :  { %674 = vsyncadd [#allocation8], 4294966272  ;;  %v682_v0 = vmov 0.0|0.0   ;;  %vm683_vm0 = vmmov 0   ;;  %v684_v1 = vmov 0.0   ;;  %v99_v2 = vld [vmem:[#allocation4] sm:$0xff] }
  0x59   :  { %520 = vmatprep.subr.bf16.mxu0 %v682_v0  ;;  %484 = vmatprep.mubr.msk.f32.mxu0 %vm683_vm0, %v684_v1  ;;  %v100_v3 = vld [vmem:[#allocation4 + $0x8] sm:$0xff]  ;;  %v101_v4 = vld [vmem:[#allocation4 + $0x10] sm:$0xff]  ;;  %v102_v6 = vld [vmem:[#allocation4 + $0x18] sm:$0xff]  ;;  %vm110_vm1 = vcmask 261120   ;;  %s685_s30 = smov 32  }
  0x5a   :  { %526 = vmatprep.subr.bf16.mxu1 %v682_v0  ;;  %495 = vmatprep.mubr.msk.f32.mxu1 %vm683_vm0, %v684_v1  ;;  %v521_v5 = vpack.c.bf16 %v100_v3, %v99_v2  ;;  %v524_v7 = vpack.c.bf16 %v102_v6, %v101_v4  ;;  %v98_v8 = vld [vmem:[#allocation2] sm:$0xff]  ;;  %v185_v9 = vld [vmem:[#allocation6] sm:$0xff]  ;;  %v186_v10 = vld [vmem:[#allocation6 + $0x8] sm:$0xff] }
  0x5b   :  { %v269_v11 = vld [vmem:[#allocation7] sm:$0xff]  ;;  %v527_v12 = vpack.c.bf16 %v186_v10, %v185_v9  ;;  %v270_v13 = vld [vmem:[#allocation7 + $0x8] sm:$0xff]  ;;  %v187_v14 = vld [vmem:[#allocation6 + $0x10] sm:$0xff] }
  0x5c   :  { %522 = vmatpush3.bf16.msra.mxu0 %v521_v5  ;;  %v188_v15 = vld [vmem:[#allocation6 + $0x18] sm:$0xff]  ;;  %v533_v16 = vpack.c.bf16 %v270_v13, %v269_v11  ;;  %v271_v17 = vld [vmem:[#allocation7 + $0x10] sm:$0xff]  ;;  %v448_v21 = vld [vmem:[%s834_s2] ss:$0 sm:$0xff] }
  0x5d   :  { %523 = vmatprep.subr.bf16.mxu0 %v682_v0  ;;  %v272_v18 = vld [vmem:[#allocation7 + $0x18] sm:$0xff]  ;;  %528 = vmatpush3.bf16.msra.mxu1 %v527_v12  ;;  %v530_v19 = vpack.c.bf16 %v188_v15, %v187_v14  ;;  %v351_v26 = vld [vmem:[#allocation9] sm:$0xff]  ;;  %v352_v27 = vld [vmem:[#allocation9 + $0x8] sm:$0xff] }
  0x5e   :  { %529 = vmatprep.subr.bf16.mxu1 %v682_v0  ;;  %v536_v20 = vpack.c.bf16 %v272_v18, %v271_v17  ;;  %v353_v28 = vld [vmem:[#allocation9 + $0x10] sm:$0xff]  ;;  %v539_v29 = vpack.c.bf16 %v352_v27, %v351_v26  ;;  %v354_v30 = vld [vmem:[#allocation9 + $0x18] sm:$0xff]  ;;  %v450_v32 = vld [vmem:[%s836_s4] ss:$0 sm:$0xff] }
  0x5f   :  { %v542_v31 = vpack.c.bf16 %v354_v30, %v353_v28  ;;  %v452_v33 = vld [vmem:[%s838_s6] ss:$0 sm:$0xff] }
  0x60   :  { %525 = vmatpush3.bf16.msra.mxu0 %v524_v7  ;;  %v454_v41 = vld [vmem:[%s840_s8] ss:$0 sm:$0xff] }
  0x61   :  { %532 = vmatprep.subr.bf16.mxu0 %v682_v0  ;;  %531 = vmatpush3.bf16.msra.mxu1 %v530_v19 }
  0x62   :  { %538 = vmatprep.subr.bf16.mxu1 %v682_v0 }
  0x63   :  { %485 = vmatmul.mubr.msk.f32.vlgmr.msra.gmra.mrb[0].mxu0 %vm110_vm1, %v98_v8 }
  0x64   :  { %506 = vmatprep.mubr.msk.f32.mxu0 %vm683_vm0, %v684_v1  ;;  %534 = vmatpush3.bf16.msra.mxu0 %v533_v16 }
  0x65   :  { %535 = vmatprep.subr.bf16.mxu0 %v682_v0 }
  0x68   :  { %537 = vmatpush3.bf16.msra.mxu0 %v536_v20 }
 0x136   :  { %v180_v22 = vpop.f32.mrb[0].mxu0 }
 0x137   :  { %v181_v23 = vadd.f32 %v448_v21, %v180_v22  ;;  %v486_v24 = vpop.f32.mrb[1].mxu0 }
 0x139   :  { %555 = vtanh.f32 %v181_v23 }
 0x143   :  { %v556_v25 = vpop.eup %555 }
 0x144   :  { %496 = vmatmul.mubr.msk.f32.vlgmr.msra.gmra.mrb[0].mxu1 %vm110_vm1, %v556_v25  ;;  %507 = vmatmul.mubr.msk.f32.vlgmr.msra.gmra.mrb[2].mxu0 %vm110_vm1, %v556_v25 }
 0x145   :  { %517 = vmatprep.mubr.msk.f32.mxu1 %vm683_vm0, %v684_v1  ;;  %540 = vmatpush3.bf16.msra.mxu1 %v539_v29 }
 0x146   :  { %541 = vmatprep.subr.bf16.mxu1 %v682_v0 }
 0x149   :  { %543 = vmatpush3.bf16.msra.mxu1 %v542_v31 }
 0x217   :  { %v265_v34 = vpop.f32.mrb[0].mxu1  ;;  %v346_v35 = vpop.f32.mrb[2].mxu0 }
 0x218   :  { %v266_v36 = vadd.f32 %v450_v32, %v265_v34  ;;  %v347_v37 = vadd.f32 %v452_v33, %v346_v35  ;;  %v497_v38 = vpop.f32.mrb[1].mxu1  ;;  %v508_v39 = vpop.f32.mrb[3].mxu0 }
 0x21a   :  { %557 = vtanh.f32 %v347_v37  ;;  %436 = vrot.lane.b32.xlu0 %v266_v36, %s685_s30 }
 0x224   :  { %v558_v40 = vpop.eup %557 }
 0x225   :  { %518 = vmatmul.mubr.msk.f32.vlgmr.msra.gmra.mrb[2].mxu1 %vm110_vm1, %v558_v40 }
 0x28c   :  { %v437_v45 = vpop.permute.xlu0 %436 }
 0x2f8   :  { %v431_v42 = vpop.f32.mrb[2].mxu1 }
 0x2f9   :  { %v432_v43 = vadd.f32 %v454_v41, %v431_v42  ;;  %v519_v44 = vpop.f32.mrb[3].mxu1 }
 0x2fb   :  { %v439_v46 = vsel %vm110_vm1, %v432_v43, %v437_v45 }
 0x2fc   :  { %440 = vst [vmem:[%s841_s9] sm:$0xff] %v439_v46 }
 0x2fd   :  { %445 = vsyncpa [#allocation3], 1 }
 0x2fe   :  { %446 = vsyncpa [#allocation5], 1 }
 0x2ff   :  { %447 = vsyncpa [#allocation8], 1 }

</bundles_post_ra>
